<compile_context>
chip_gen: v7x
topology: tpu7x:2x2x1
jax: 0.10.0
libtpu: 0.0.40
codegen_flags: <defaults>
</compile_context>

<pallas_src>
import functools

import jax
import jax.numpy as jnp
import numpy as np
from jax.experimental import pallas as pl
from jax.experimental.pallas import tpu as pltpu

# ---------------- module hyper-parameters (this config) ----------------
TEXT_DIM = 32        # text_feat_dim == output_dim of the attention combiner
CAT_DIM = 16         # cat_feat_dim  (<= TEXT_DIM -> weight_cat is (16, 32))
NUM_DIM = 8          # numerical_feat_dim (<= TEXT_DIM)
NEG_SLOPE = 0.02     # slope actually used in forward(): F.leaky_relu(alpha, 0.02)

ROW_PACK = 4                      # batch rows packed per lane-row
LANES = ROW_PACK * TEXT_DIM       # 128: lane-dense output width
N_H = 6 * LANES                   # 768: [w_text|w_cat|w_num|g_text|g_cat|g_num]
SUB = 16                          # packed-row (sublane) alignment, bf16-safe
_MAX_PACKED_TILE = 4096           # <= 16K batch rows / grid step (VMEM ceiling)


def _round_up(x, m):
    return ((x + m - 1) // m) * m


def _cdiv(a, b):
    return -(-a // b)


def _maybe_cast(x, dtype):
    return x if x.dtype == dtype else x.astype(dtype)


def _is_dual_tensorcore_chip():
    """Best-effort: True only for chips where a >=2-step grid lets
    dimension_semantics=("parallel",) shard the batch across 2 TensorCores
    (v4 / v5p / v7x).  Single-TC chips (v5e / v6e) return False."""
    try:
        kind = jax.devices()[0].device_kind.lower()
    except Exception:
        return False
    if any(s in kind for s in ("lite", "v5e", "v6e", "v6 lite")):
        return False
    return any(s in kind for s in ("v7", "v5p", "v4"))


# ---------------- kernel ----------------
def _attention_combiner_kernel(xt_ref, xc_ref, xn_ref, wt_ref, wc_ref, wn_ref,
                               out_ref, *, approx_recip):
    """One batch tile (`tile` packed rows == 4*tile batch rows).

    h = xt @ Wt + xc @ Wc + xn @ Wn  produces, per packed row, the three
    projections plus the three attention logits already broadcast across each
    32-lane group, so everything after the MXU is full-width VPU/EUP work and
    the store is an unmasked, lane-dense (tile, 128) write.
    """
    h = jnp.dot(xt_ref[...], wt_ref[...], preferred_element_type=jnp.float32)
    h = h + jnp.dot(xc_ref[...], wc_ref[...], preferred_element_type=jnp.float32)
    h = h + jnp.dot(xn_ref[...], wn_ref[...], preferred_element_type=jnp.float32)

    w_text = h[:, 0 * LANES:1 * LANES]
    w_cat = h[:, 1 * LANES:2 * LANES]
    w_num = h[:, 2 * LANES:3 * LANES]
    g_text = h[:, 3 * LANES:4 * LANES]   # logits, already broadcast over the 32
    g_cat = h[:, 4 * LANES:5 * LANES]    # lanes of their packed row -> no
    g_num = h[:, 5 * LANES:6 * LANES]    # cross-lane (XLU) work needed below.

    # leaky_relu(., 0.02): for 0 < slope < 1 this is max(v, slope*v).
    lrelu = lambda v: jnp.maximum(v, NEG_SLOPE * v)
    g_text, g_cat, g_num = lrelu(g_text), lrelu(g_cat), lrelu(g_num)

    # numerically-stable 3-way softmax over the modalities
    m = jnp.maximum(jnp.maximum(g_text, g_cat), g_num)
    e_t = jnp.exp(g_text - m)
    e_c = jnp.exp(g_cat - m)
    e_n = jnp.exp(g_num - m)
    denom = e_t + e_c + e_n
    if approx_recip:                      # bf16 path: EUP vrcp slot, ~free
        inv = pl.reciprocal(denom, approx=True)
    else:                                 # f32 validation path: exact divide
        inv = 1.0 / denom

    out_ref[...] = ((e_t * w_text + e_c * w_cat + e_n * w_num) * inv).astype(
        out_ref.dtype)


# ---------------- fused, 4-row-packed weight slabs ----------------
def _bdiag(block):
    """Replicate `block` ROW_PACK times along the block diagonal."""
    return jnp.kron(jnp.eye(ROW_PACK, dtype=block.dtype), block)


def _bcast_cols(col):
    """(k,) -> (k, TEXT_DIM): same logit column in every lane of a 32-lane group."""
    return jnp.broadcast_to(col[:, None], (col.shape[0], TEXT_DIM))


def _build_packed_weights(w_transformer, w_cat, w_num, weight_a):
    """Column layout of h (N_H = 6*128):
      [0,128)   w_text   (packed row r occupies lanes [32r, 32r+32))
      [128,256) w_cat
      [256,384) w_num
      [384,512) g_text = w_text.a_l + w_text.a_r   (broadcast over 32 lanes)
      [512,640) g_cat  = w_text.a_l + w_cat.a_r
      [640,768) g_num  = w_text.a_l + w_num.a_r
    """
    wt = w_transformer.astype(jnp.float32)
    wc = w_cat.astype(jnp.float32)
    wn = w_num.astype(jnp.float32)
    a = weight_a.astype(jnp.float32)
    a_l, a_r = a[0, :TEXT_DIM], a[0, TEXT_DIM:]

    t_lr = wt @ (a_l + a_r)   # (32,)  text rows -> g_text
    t_l = wt @ a_l            # (32,)  text rows -> shared part of g_cat / g_num
    c_r = wc @ a_r            # (16,)  cat rows  -> g_cat
    n_r = wn @ a_r            # (8,)   num rows  -> g_num

    zt = jnp.zeros((ROW_PACK * TEXT_DIM, LANES), jnp.float32)
    zc = jnp.zeros((ROW_PACK * CAT_DIM, LANES), jnp.float32)
    zn = jnp.zeros((ROW_PACK * NUM_DIM, LANES), jnp.float32)

    w_text_slab = jnp.concatenate(
        [_bdiag(wt), zt, zt,
         _bdiag(_bcast_cols(t_lr)),
         _bdiag(_bcast_cols(t_l)),
         _bdiag(_bcast_cols(t_l))], axis=1)            # (128, 768)
    w_cat_slab = jnp.concatenate(
        [zc, _bdiag(wc), zc, zc, _bdiag(_bcast_cols(c_r)), zc], axis=1)  # (64, 768)
    w_num_slab = jnp.concatenate(
        [zn, zn, _bdiag(wn), zn, zn, _bdiag(_bcast_cols(n_r))], axis=1)  # (32, 768)
    return w_text_slab, w_cat_slab, w_num_slab


# ---------------- wrapper ----------------
def tabular_feat_combiner_attention(text_feats, cat_feats, num_feats,
                                    w_transformer, w_cat, w_num, weight_a,
                                    *, batch_tile=8192):
    """Pallas forward of the 'attention_on_cat_and_numerical_feats' combiner.

    text (B, 32), cat (B, 16), num (B, 8); weights as in the PyTorch module.
    Returns (B, 32) in the dtype of `text_feats` (pass bf16 activations for the
    bf16 HBM-I/O path — no wrapper-side cast/concat pass is performed)."""
    B = text_feats.shape[0]
    assert text_feats.shape[1] == TEXT_DIM
    assert cat_feats.shape == (B, CAT_DIM)
    assert num_feats.shape == (B, NUM_DIM)

    io_dtype = text_feats.dtype
    cat_feats = _maybe_cast(cat_feats, io_dtype)
    num_feats = _maybe_cast(num_feats, io_dtype)

    # Pad only to a multiple of ROW_PACK*SUB = 64 rows (needed for the free
    # 4-row packing reshape + sublane alignment) and only on the three small
    # unfused inputs. No pad up to a tile multiple: the ragged last grid block
    # is handled by Pallas (OOB reads give garbage rows whose outputs are
    # dropped on writeback).
    # TODO(synk): fully in-kernel tail masking (scalar-prefetched B) would also
    # remove this small pad copy for B % 64 != 0.
    B_pad = _round_up(max(B, 1), ROW_PACK * SUB)
    if B_pad != B:
        padn = B_pad - B
        text_feats = jnp.pad(text_feats, ((0, padn), (0, 0)))
        cat_feats = jnp.pad(cat_feats, ((0, padn), (0, 0)))
        num_feats = jnp.pad(num_feats, ((0, padn), (0, 0)))
    rows = B_pad // ROW_PACK

    # Free, contiguous 4-row packing reshapes (no HBM copy).
    xt = text_feats.reshape(rows, ROW_PACK * TEXT_DIM)   # (rows, 128)
    xc = cat_feats.reshape(rows, ROW_PACK * CAT_DIM)     # (rows, 64)
    xn = num_feats.reshape(rows, ROW_PACK * NUM_DIM)     # (rows, 32)

    wt_s, wc_s, wn_s = _build_packed_weights(w_transformer, w_cat, w_num,
                                             weight_a)
    wt_s = wt_s.astype(io_dtype)
    wc_s = wc_s.astype(io_dtype)
    wn_s = wn_s.astype(io_dtype)

    # ---- tile selection (in packed rows; 1 packed row == 4 batch rows) ----
    max_tile = max(SUB,
                   (min(batch_tile // ROW_PACK, _MAX_PACKED_TILE) // SUB) * SUB)
    tile = min(max_tile, rows)
    # Force >=2 grid steps only on dual-TensorCore chips so the "parallel"
    # batch axis is split across cores; on v5e/v6e a forced split is pure
    # per-step overhead.
    if _is_dual_tensorcore_chip() and rows >= 2 * SUB and _cdiv(rows, tile) < 2:
        tile = _round_up(_cdiv(rows, 2), SUB)
    grid = (_cdiv(rows, tile),)

    # Explicit VMEM budget for big tiles (f32 (tile, 768) intermediate + temps
    # + double-buffered I/O); default scoped limit is plenty for small tiles.
    vmem_limit = (48 << 20) if tile > 512 else None

    kernel = functools.partial(_attention_combiner_kernel,
                               approx_recip=(io_dtype != jnp.float32))

    out_packed = pl.pallas_call(
        kernel,
        out_shape=jax.ShapeDtypeStruct((rows, LANES), io_dtype),
        grid=grid,
        in_specs=[
            pl.BlockSpec((tile, ROW_PACK * TEXT_DIM), lambda i: (i, 0)),
            pl.BlockSpec((tile, ROW_PACK * CAT_DIM), lambda i: (i, 0)),
            pl.BlockSpec((tile, ROW_PACK * NUM_DIM), lambda i: (i, 0)),
            # weight slabs: constant index_map -> stay resident, DMA'd once
            pl.BlockSpec((ROW_PACK * TEXT_DIM, N_H), lambda i: (0, 0)),
            pl.BlockSpec((ROW_PACK * CAT_DIM, N_H), lambda i: (0, 0)),
            pl.BlockSpec((ROW_PACK * NUM_DIM, N_H), lambda i: (0, 0)),
        ],
        out_specs=pl.BlockSpec((tile, LANES), lambda i: (i, 0)),
        compiler_params=pltpu.CompilerParams(
            dimension_semantics=("parallel",),
            vmem_limit_bytes=vmem_limit),
    )(xt, xc, xn, wt_s, wc_s, wn_s)

    out = out_packed.reshape(B_pad, TEXT_DIM)   # free contiguous un-pack
    return out[:B] if B_pad != B else out


# ---------------- pure-JAX reference (PyTorch forward transcription) ----------------
def _reference(text, cat, num, wt, wc, wn, a):
    w_text = text @ wt
    w_cat = cat @ wc
    w_num = num @ wn
    g_text = (jnp.concatenate([w_text, w_text], -1) * a).sum(1)
    g_cat = (jnp.concatenate([w_text, w_cat], -1) * a).sum(1)
    g_num = (jnp.concatenate([w_text, w_num], -1) * a).sum(1)
    alpha = jnp.stack([g_text, g_cat, g_num], axis=1)
    alpha = jnp.where(alpha >= 0, alpha, NEG_SLOPE * alpha)
    alpha = jax.nn.softmax(alpha, axis=-1)
    combined = jnp.stack([w_text, w_cat, w_num], axis=1)
    return (alpha[:, :, None] * combined).sum(axis=1)


def _glorot(key, shape):
    fan_in, fan_out = shape[-2], shape[-1]
    stdv = float(np.sqrt(6.0 / (fan_in + fan_out)))
    return jax.random.uniform(key, shape, jnp.float32, minval=-stdv, maxval=stdv)


if __name__ == "__main__":
    key = jax.random.PRNGKey(0)
    kt, kc, kn, kwt, kwc, kwn, ka, k2 = jax.random.split(key, 8)

    B = 8
    text_feats = jax.random.normal(kt, (B, TEXT_DIM), jnp.float32)
    cat_feats = jax.random.normal(kc, (B, CAT_DIM), jnp.float32)
    num_feats = jax.random.normal(kn, (B, NUM_DIM), jnp.float32)

    # Parameters (deterministic glorot, matching the shapes built in __init__).
    w_transformer = _glorot(kwt, (TEXT_DIM, TEXT_DIM))
    w_cat = _glorot(kwc, (CAT_DIM, TEXT_DIM))
    w_num = _glorot(kwn, (NUM_DIM, TEXT_DIM))
    weight_a = _glorot(ka, (1, 2 * TEXT_DIM))
    # bias_cat / bias_num / bias_transformer / bias are defined in __init__ but
    # unused in the attention forward path, so they are intentionally omitted.
    # TODO(synk): other combine_feat_method branches (concat / MLP / gating /
    # weighted-sum) are not exercised by this synthetic instance.

    # --- f32 I/O path (exact divide): check against the reference ---
    out_f32 = jax.block_until_ready(tabular_feat_combiner_attention(
        text_feats, cat_feats, num_feats, w_transformer, w_cat, w_num, weight_a))
    ref = jax.block_until_ready(
        _reference(text_feats, cat_feats, num_feats, w_transformer, w_cat,
                   w_num, weight_a))
    np.testing.assert_allclose(np.asarray(out_f32, np.float32), np.asarray(ref),
                               rtol=2e-2, atol=5e-3)

    # --- bf16 HBM-I/O path (production): caller passes bf16 activations, so no
    #     wrapper-side cast pass; compare against a reference on the same
    #     bf16-quantized operands ---
    qb = lambda v: v.astype(jnp.bfloat16)
    qf = lambda v: v.astype(jnp.bfloat16).astype(jnp.float32)
    out_bf16 = jax.block_until_ready(tabular_feat_combiner_attention(
        qb(text_feats), qb(cat_feats), qb(num_feats),
        w_transformer, w_cat, w_num, weight_a))
    ref_q = jax.block_until_ready(
        _reference(qf(text_feats), qf(cat_feats), qf(num_feats),
                   qf(w_transformer), qf(w_cat), qf(w_num), qf(weight_a)))
    np.testing.assert_allclose(np.asarray(out_bf16, np.float32),
                               np.asarray(ref_q), rtol=5e-2, atol=3e-2)

    # --- multi-grid-step + row-padding path (B not a multiple of 64, small
    #     batch_tile so the grid has >1 step) ---
    B2 = 200
    k2t, k2c, k2n = jax.random.split(k2, 3)
    text2 = jax.random.normal(k2t, (B2, TEXT_DIM), jnp.float32)
    cat2 = jax.random.normal(k2c, (B2, CAT_DIM), jnp.float32)
    num2 = jax.random.normal(k2n, (B2, NUM_DIM), jnp.float32)
    out2 = jax.block_until_ready(tabular_feat_combiner_attention(
        text2, cat2, num2, w_transformer, w_cat, w_num, weight_a,
        batch_tile=128))
    ref2 = jax.block_until_ready(
        _reference(text2, cat2, num2, w_transformer, w_cat, w_num, weight_a))
    np.testing.assert_allclose(np.asarray(out2, np.float32), np.asarray(ref2),
                               rtol=2e-2, atol=5e-3)

    print("KERNEL_OK")
</pallas_src>

<mosaic_0001>
module attributes {stable_mosaic.version = 11 : i64} {
  func.func @_attention_combiner_kernel(%arg0: i32, %arg1: memref<16x128xf32, #tpu.memory_space<vmem>>, %arg2: memref<16x64xf32, #tpu.memory_space<vmem>>, %arg3: memref<16x32xf32, #tpu.memory_space<vmem>>, %arg4: memref<128x768xf32, #tpu.memory_space<vmem>>, %arg5: memref<64x768xf32, #tpu.memory_space<vmem>>, %arg6: memref<32x768xf32, #tpu.memory_space<vmem>>, %arg7: memref<16x128xf32, #tpu.memory_space<vmem>>) attributes {dimension_semantics = [#tpu.dimension_semantics<parallel>], iteration_bounds = array<i64: 1>, scalar_prefetch = 0 : i64, scratch_operands = 0 : i64, tpu.core_type = #tpu.core_type<tc>, window_params = [{transform_indices = @transform_0, window_bounds = array<i64: 16, 128>}, {transform_indices = @transform_1, window_bounds = array<i64: 16, 64>}, {transform_indices = @transform_2, window_bounds = array<i64: 16, 32>}, {pipeline_mode = #tpu.pipeline_mode<synchronous>, transform_indices = @transform_3, window_bounds = array<i64: 128, 768>}, {pipeline_mode = #tpu.pipeline_mode<synchronous>, transform_indices = @transform_4, window_bounds = array<i64: 64, 768>}, {pipeline_mode = #tpu.pipeline_mode<synchronous>, transform_indices = @transform_5, window_bounds = array<i64: 32, 768>}, {transform_indices = @transform_6, window_bounds = array<i64: 16, 128>}]} {
    %c0 = arith.constant 0 : index
    %c0_0 = arith.constant 0 : index
    %0 = vector.load %arg1[%c0, %c0_0] : memref<16x128xf32, #tpu.memory_space<vmem>>, vector<16x128xf32>
    %c0_1 = arith.constant 0 : index
    %c0_2 = arith.constant 0 : index
    %1 = vector.load %arg4[%c0_1, %c0_2] : memref<128x768xf32, #tpu.memory_space<vmem>>, vector<128x768xf32>
    %cst = arith.constant dense<0.000000e+00> : vector<16x768xf32>
    %2 = tpu.matmul %0, %1, %cst {dimension_numbers = #tpu.dot_dimension_numbers<[1], [0], [0], [1], [0, 0, 1, 1], [], []>} : vector<16x128xf32>, vector<128x768xf32>, vector<16x768xf32> -> vector<16x768xf32>
    %c0_3 = arith.constant 0 : index
    %c0_4 = arith.constant 0 : index
    %3 = vector.load %arg2[%c0_3, %c0_4] : memref<16x64xf32, #tpu.memory_space<vmem>>, vector<16x64xf32>
    %c0_5 = arith.constant 0 : index
    %c0_6 = arith.constant 0 : index
    %4 = vector.load %arg5[%c0_5, %c0_6] : memref<64x768xf32, #tpu.memory_space<vmem>>, vector<64x768xf32>
    %cst_7 = arith.constant dense<0.000000e+00> : vector<16x768xf32>
    %5 = tpu.matmul %3, %4, %cst_7 {dimension_numbers = #tpu.dot_dimension_numbers<[1], [0], [0], [1], [0, 0, 1, 1], [], []>} : vector<16x64xf32>, vector<64x768xf32>, vector<16x768xf32> -> vector<16x768xf32>
    %6 = arith.addf %2, %5 : vector<16x768xf32>
    %c0_8 = arith.constant 0 : index
    %c0_9 = arith.constant 0 : index
    %7 = vector.load %arg3[%c0_8, %c0_9] : memref<16x32xf32, #tpu.memory_space<vmem>>, vector<16x32xf32>
    %c0_10 = arith.constant 0 : index
    %c0_11 = arith.constant 0 : index
    %8 = vector.load %arg6[%c0_10, %c0_11] : memref<32x768xf32, #tpu.memory_space<vmem>>, vector<32x768xf32>
    %cst_12 = arith.constant dense<0.000000e+00> : vector<16x768xf32>
    %9 = tpu.matmul %7, %8, %cst_12 {dimension_numbers = #tpu.dot_dimension_numbers<[1], [0], [0], [1], [0, 0, 1, 1], [], []>} : vector<16x32xf32>, vector<32x768xf32>, vector<16x768xf32> -> vector<16x768xf32>
    %10 = arith.addf %6, %9 : vector<16x768xf32>
    %11 = vector.extract_strided_slice %10 {offsets = [0, 0], sizes = [16, 128], strides = [1, 1]} : vector<16x768xf32> to vector<16x128xf32>
    %12 = vector.extract_strided_slice %10 {offsets = [0, 128], sizes = [16, 128], strides = [1, 1]} : vector<16x768xf32> to vector<16x128xf32>
    %13 = vector.extract_strided_slice %10 {offsets = [0, 256], sizes = [16, 128], strides = [1, 1]} : vector<16x768xf32> to vector<16x128xf32>
    %14 = vector.extract_strided_slice %10 {offsets = [0, 384], sizes = [16, 128], strides = [1, 1]} : vector<16x768xf32> to vector<16x128xf32>
    %15 = vector.extract_strided_slice %10 {offsets = [0, 512], sizes = [16, 128], strides = [1, 1]} : vector<16x768xf32> to vector<16x128xf32>
    %16 = vector.extract_strided_slice %10 {offsets = [0, 640], sizes = [16, 128], strides = [1, 1]} : vector<16x768xf32> to vector<16x128xf32>
    %cst_13 = arith.constant 2.000000e-02 : f32
    %17 = vector.broadcast %cst_13 : f32 to vector<16x128xf32>
    %18 = arith.mulf %17, %14 : vector<16x128xf32>
    %19 = arith.maximumf %14, %18 : vector<16x128xf32>
    %cst_14 = arith.constant 2.000000e-02 : f32
    %20 = vector.broadcast %cst_14 : f32 to vector<16x128xf32>
    %21 = arith.mulf %20, %15 : vector<16x128xf32>
    %22 = arith.maximumf %15, %21 : vector<16x128xf32>
    %cst_15 = arith.constant 2.000000e-02 : f32
    %23 = vector.broadcast %cst_15 : f32 to vector<16x128xf32>
    %24 = arith.mulf %23, %16 : vector<16x128xf32>
    %25 = arith.maximumf %16, %24 : vector<16x128xf32>
    %26 = arith.maximumf %19, %22 : vector<16x128xf32>
    %27 = arith.maximumf %26, %25 : vector<16x128xf32>
    %28 = arith.subf %19, %27 : vector<16x128xf32>
    %29 = math.exp %28 : vector<16x128xf32>
    %30 = arith.subf %22, %27 : vector<16x128xf32>
    %31 = math.exp %30 : vector<16x128xf32>
    %32 = arith.subf %25, %27 : vector<16x128xf32>
    %33 = math.exp %32 : vector<16x128xf32>
    %34 = arith.addf %29, %31 : vector<16x128xf32>
    %35 = arith.addf %34, %33 : vector<16x128xf32>
    %cst_16 = arith.constant 1.000000e+00 : f32
    %36 = vector.broadcast %cst_16 : f32 to vector<16x128xf32>
    %37 = arith.divf %36, %35 : vector<16x128xf32>
    %38 = arith.mulf %29, %11 : vector<16x128xf32>
    %39 = arith.mulf %31, %12 : vector<16x128xf32>
    %40 = arith.addf %38, %39 : vector<16x128xf32>
    %41 = arith.mulf %33, %13 : vector<16x128xf32>
    %42 = arith.addf %40, %41 : vector<16x128xf32>
    %43 = arith.mulf %42, %37 : vector<16x128xf32>
    %c0_17 = arith.constant 0 : index
    %c0_18 = arith.constant 0 : index
    %44 = vector.load %arg7[%c0_17, %c0_18] : memref<16x128xf32, #tpu.memory_space<vmem>>, vector<16x128xf32>
    tpu.vector_store %arg7[%c0_17, %c0_18], %43 {strides = array<i32>} : memref<16x128xf32, #tpu.memory_space<vmem>>, vector<16x128xf32>,
    return
  }
  func.func @transform_0(%arg0: i32) -> (i32, i32) {
    %c0_i32 = arith.constant 0 : i32
    %c0_i32_0 = arith.constant 0 : i32
    return %arg0, %c0_i32 : i32, i32
  }
  func.func @transform_1(%arg0: i32) -> (i32, i32) {
    %c0_i32 = arith.constant 0 : i32
    %c0_i32_0 = arith.constant 0 : i32
    return %arg0, %c0_i32 : i32, i32
  }
  func.func @transform_2(%arg0: i32) -> (i32, i32) {
    %c0_i32 = arith.constant 0 : i32
    %c0_i32_0 = arith.constant 0 : i32
    return %arg0, %c0_i32 : i32, i32
  }
  func.func @transform_3(%arg0: i32) -> (i32, i32) {
    %c0_i32 = arith.constant 0 : i32
    %c0_i32_0 = arith.constant 0 : i32
    %c0_i32_1 = arith.constant 0 : i32
    return %c0_i32, %c0_i32_0 : i32, i32
  }
  func.func @transform_4(%arg0: i32) -> (i32, i32) {
    %c0_i32 = arith.constant 0 : i32
    %c0_i32_0 = arith.constant 0 : i32
    %c0_i32_1 = arith.constant 0 : i32
    return %c0_i32, %c0_i32_0 : i32, i32
  }
  func.func @transform_5(%arg0: i32) -> (i32, i32) {
    %c0_i32 = arith.constant 0 : i32
    %c0_i32_0 = arith.constant 0 : i32
    %c0_i32_1 = arith.constant 0 : i32
    return %c0_i32, %c0_i32_0 : i32, i32
  }
  func.func @transform_6(%arg0: i32) -> (i32, i32) {
    %c0_i32 = arith.constant 0 : i32
    %c0_i32_0 = arith.constant 0 : i32
    return %arg0, %c0_i32 : i32, i32
  }
}

</mosaic_0001>

<bundles_post_ra>
// kernel: tpu_custom_call.1
= control target key start
LH: loop header
LB: loop body
LE: loop exit
PB: predicated region body
PF: predicated region fallthrough
CT: control target
= control target key end

     0   :  { %11 = vsyncpa [#allocation3], 0  ;;  %s1694_s0 = inlined_call_operand.hbm [shape: f32[16,128], index: 0, kind: input, shape index: {}]   ;;  %s1695_s1 = inlined_call_operand.hbm [shape: f32[16,64], index: 1, kind: input, shape index: {}]   ;;  %s1696_s2 = inlined_call_operand.hbm [shape: f32[16,32], index: 2, kind: input, shape index: {}]   ;;  %s1697_s3 = inlined_call_operand.hbm [shape: f32[128,768], index: 3, kind: input, shape index: {}]   ;;  %s1698_s4 = inlined_call_operand.hbm [shape: f32[64,768], index: 4, kind: input, shape index: {}]   ;;  %s1699_s5 = inlined_call_operand.hbm [shape: f32[32,768], index: 5, kind: input, shape index: {}]   ;;  %s1700_s6 = inlined_call_operand.hbm [shape: f32[16,128], index: 6, kind: output, shape index: {}]  }
   0x1   :  { %12 = vsyncpa [#allocation6], 0 }
   0x2   :  { %13 = vsyncpa [#allocation9], 0 }
   0x3   :  { %14 = vsyncpa [#allocation12], 0 }
   0x4   :  { %15 = vsyncpa [#allocation4], 0  ;;  %s1471_s21 = smov [#allocation5]   ;;  %s1472_s23 = smov [#allocation8]  }
   0x5   :  { %s33_s22 = sshll.u32 %s1471_s21, 4  ;;  %s57_s24 = sshll.u32 %s1472_s23, 4  ;;  %s34_s22 = int_to_ptr.vmem [resolvable:$true] %s33_s22  ;;  %s1518_s24 = int_to_ptr.vmem [resolvable:$true] %s57_s24 }
   0x6   :  { %s1307_s27 = scalar_lea.hbm %s1695_s1, 256 }
   0x7   :  { %p1308_p0 = scmp.ne.s32.totalorder %s1695_s1, %s1307_s27  ;;  %p1311_p1 = scmp.lt.u32.totalorder %s1307_s27, %s1695_s1 }
   0x9   :  { %p1313_p2 = pnand %p1311_p1, %p1308_p0 }
   0xb   :  { %1316 = shalt.err (!%p1313_p2)
}
   0xc   :  { %s1317_s8 = scalar_lea.vmem %s34_s22, 256  ;;  %p1322_p4 = scmp.lt.s32.totalorder %s34_s22, %s34_s22 }
   0xd   :  { %p1318_p3 = scmp.ne.s32.totalorder %s34_s22, %s1317_s8  ;;  %p1323_p5 = scmp.lt.s32.totalorder %s1317_s8, %s1317_s8 }
   0xf   :  { %p1324_p6 = por %p1323_p5, %p1322_p4 }
  0x11   :  { %p1325_p7 = pnand %p1324_p6, %p1318_p3 }
  0x13   :  { %1328 = shalt.err (!%p1325_p7)
}
  0x14   :  { %s1473_s9 = smov 128   ;;  %s1474_s10 = smov 8  }
  0x15   :  { %39 = dma.hbm_to_vmem [thread:$0]  %s1695_s1, 256, %s34_s22, [#allocation6], %s1473_s9, %s1473_s9, %s1474_s10  }
  0x16   :  { %s1329_s15 = scalar_lea.hbm %s1697_s3, 12288 }
  0x17   :  { %p1330_p8 = scmp.ne.s32.totalorder %s1697_s3, %s1329_s15  ;;  %p1333_p9 = scmp.lt.u32.totalorder %s1329_s15, %s1697_s3 }
  0x19   :  { %p1335_p10 = pnand %p1333_p9, %p1330_p8 }
  0x1b   :  { %1338 = shalt.err (!%p1335_p10)
}
  0x1c   :  { %s1339_s20 = scalar_lea.vmem %s1518_s24, 12288  ;;  %p1344_p12 = scmp.lt.s32.totalorder %s1518_s24, %s1518_s24 }
  0x1d   :  { %p1340_p11 = scmp.ne.s32.totalorder %s1518_s24, %s1339_s20  ;;  %p1345_p13 = scmp.lt.s32.totalorder %s1339_s20, %s1339_s20 }
  0x1f   :  { %p1346_p0 = por %p1345_p13, %p1344_p12 }
  0x21   :  { %p1347_p1 = pnand %p1346_p0, %p1340_p11 }
  0x23   :  { %1350 = shalt.err (!%p1347_p1)
}
  0x24   :  { %s1475_s1 = smov 768   ;;  %s1476_s21 = smov 48  }
  0x25   :  { %63 = dma.hbm_to_vmem [thread:$0]  %s1697_s3, 12288, %s1518_s24, [#allocation9], %s1475_s1, %s1475_s1, %s1476_s21  }
  0x26   :  { %s1477_s25 = smov [#allocation2]   ;;  %s1478_s27 = smov [#allocation7]  }
  0x27   :  { %s21_s26 = sshll.u32 %s1477_s25, 4  ;;  %s45_s28 = sshll.u32 %s1478_s27, 4  ;;  %s22_s26 = int_to_ptr.vmem [resolvable:$true] %s21_s26  ;;  %s1555_s28 = int_to_ptr.vmem [resolvable:$true] %s45_s28 }
  0x28   :  { %s1351_s7 = scalar_lea.hbm %s1694_s0, 256 }
  0x29   :  { %p1352_p2 = scmp.ne.s32.totalorder %s1694_s0, %s1351_s7  ;;  %p1355_p3 = scmp.lt.u32.totalorder %s1351_s7, %s1694_s0 }
  0x2b   :  { %p1357_p4 = pnand %p1355_p3, %p1352_p2 }
  0x2d   :  { %1360 = shalt.err (!%p1357_p4)
}
  0x2e   :  { %s1361_s3 = scalar_lea.vmem %s22_s26, 256  ;;  %p1366_p6 = scmp.lt.s32.totalorder %s22_s26, %s22_s26 }
  0x2f   :  { %p1362_p5 = scmp.ne.s32.totalorder %s22_s26, %s1361_s3  ;;  %p1367_p7 = scmp.lt.s32.totalorder %s1361_s3, %s1361_s3 }
  0x31   :  { %p1368_p8 = por %p1367_p7, %p1366_p6 }
  0x33   :  { %p1369_p9 = pnand %p1368_p8, %p1362_p5 }
  0x35   :  { %1372 = shalt.err (!%p1369_p9)
}
  0x36   :  { %27 = dma.hbm_to_vmem [thread:$0]  %s1694_s0, 256, %s22_s26, [#allocation3], %s1473_s9, %s1473_s9, %s1474_s10  }
  0x37   :  { %s1373_s17 = scalar_lea.hbm %s1696_s2, 256 }
  0x38   :  { %p1374_p10 = scmp.ne.s32.totalorder %s1696_s2, %s1373_s17  ;;  %p1377_p11 = scmp.lt.u32.totalorder %s1373_s17, %s1696_s2 }
  0x3a   :  { %p1379_p12 = pnand %p1377_p11, %p1374_p10 }
  0x3c   :  { %1382 = shalt.err (!%p1379_p12)
}
  0x3d   :  { %s1383_s23 = scalar_lea.vmem %s1555_s28, 256  ;;  %p1388_p0 = scmp.lt.s32.totalorder %s1555_s28, %s1555_s28 }
  0x3e   :  { %p1384_p13 = scmp.ne.s32.totalorder %s1555_s28, %s1383_s23  ;;  %p1389_p1 = scmp.lt.s32.totalorder %s1383_s23, %s1383_s23 }
  0x40   :  { %p1390_p2 = por %p1389_p1, %p1388_p0 }
  0x42   :  { %p1391_p3 = pnand %p1390_p2, %p1384_p13 }
  0x44   :  { %1394 = shalt.err (!%p1391_p3)
}
  0x45   :  { %51 = dma.hbm_to_vmem [thread:$0]  %s1696_s2, 256, %s1555_s28, [#allocation6], %s1473_s9, %s1473_s9, %s1474_s10  }
  0x46   :  { %s1479_s26 = smov [#allocation10]   ;;  %s1480_s29 = smov [#allocation11]  }
  0x47   :  { %s69_s27 = sshll.u32 %s1479_s26, 4  ;;  %s81_s30 = sshll.u32 %s1480_s29, 4  ;;  %s70_s27 = int_to_ptr.vmem [resolvable:$true] %s69_s27  ;;  %s1592_s30 = int_to_ptr.vmem [resolvable:$true] %s81_s30 }
  0x48   :  { %s1395_s11 = scalar_lea.hbm %s1698_s4, 6144 }
  0x49   :  { %p1396_p4 = scmp.ne.s32.totalorder %s1698_s4, %s1395_s11  ;;  %p1399_p5 = scmp.lt.u32.totalorder %s1395_s11, %s1698_s4 }
  0x4b   :  { %p1401_p6 = pnand %p1399_p5, %p1396_p4 }
  0x4d   :  { %1404 = shalt.err (!%p1401_p6)
}
  0x4e   :  { %s1405_s2 = scalar_lea.vmem %s70_s27, 6144  ;;  %p1410_p8 = scmp.lt.s32.totalorder %s70_s27, %s70_s27 }
  0x4f   :  { %p1406_p7 = scmp.ne.s32.totalorder %s70_s27, %s1405_s2  ;;  %p1411_p9 = scmp.lt.s32.totalorder %s1405_s2, %s1405_s2 }
  0x51   :  { %p1412_p10 = por %p1411_p9, %p1410_p8 }
  0x53   :  { %p1413_p11 = pnand %p1412_p10, %p1406_p7 }
  0x55   :  { %1416 = shalt.err (!%p1413_p11)
}
  0x56   :  { %75 = dma.hbm_to_vmem [thread:$0]  %s1698_s4, 6144, %s70_s27, [#allocation9], %s1475_s1, %s1475_s1, %s1476_s21  }
  0x57   :  { %s1417_s17 = scalar_lea.hbm %s1699_s5, 3072 }
  0x58   :  { %p1418_p12 = scmp.ne.s32.totalorder %s1699_s5, %s1417_s17  ;;  %p1421_p13 = scmp.lt.u32.totalorder %s1417_s17, %s1699_s5 }
  0x5a   :  { %p1423_p0 = pnand %p1421_p13, %p1418_p12 }
  0x5c   :  { %1426 = shalt.err (!%p1423_p0)
}
  0x5d   :  { %s1427_s23 = scalar_lea.vmem %s1592_s30, 3072  ;;  %p1432_p2 = scmp.lt.s32.totalorder %s1592_s30, %s1592_s30 }
  0x5e   :  { %p1428_p1 = scmp.ne.s32.totalorder %s1592_s30, %s1427_s23  ;;  %p1433_p3 = scmp.lt.s32.totalorder %s1427_s23, %s1427_s23 }
  0x60   :  { %p1434_p4 = por %p1433_p3, %p1432_p2 }
  0x62   :  { %p1435_p5 = pnand %p1434_p4, %p1428_p1 }
  0x64   :  { %1438 = shalt.err (!%p1435_p5)
}
  0x65   :  { %87 = dma.hbm_to_vmem [thread:$0]  %s1699_s5, 3072, %s1592_s30, [#allocation12], %s1475_s1, %s1475_s1, %s1476_s21  }
  0x66   :  { %1461 = dma.done.wait [#allocation3], 256  }
  0x67   :  { %1462 = vsyncadd [#allocation3], 4294967040 }
  0x68   :  { %1463 = dma.done.wait [#allocation6], 512  }
  0x69   :  { %1464 = vsyncadd [#allocation6], 4294966784 }
  0x6a   :  { %1465 = dma.done.wait [#allocation9], 18432  }
  0x6b   :  { %1466 = vsyncadd [#allocation9], 4294948864 }
  0x6c   :  { %1467 = dma.done.wait [#allocation12], 3072  }
  0x6d   :  { %1468 = vsyncadd [#allocation12], 4294964224  ;;  %v1481_v0 = vmov 0.0   ;;  %v207_v1 = vld [vmem:[#allocation10 + $0x8] sm:$0xff]  ;;  %v213_v2 = vld [vmem:[#allocation10 + $0x38] sm:$0xff]  ;;  %vm254_vm0 = vcmask 523264  }
  0x6e   :  { %325 = vmatprep.mubr.f32.mxu0 %v1481_v0  ;;  %402 = vmatprep.mubr.f32.mxu1 %v1481_v0  ;;  %v209_v3 = vld [vmem:[#allocation10 + $0x18] sm:$0xff]  ;;  %v1087_v4 = vpack.c.bf16 %v213_v2, %v207_v1  ;;  %v215_v5 = vld [vmem:[#allocation10 + $0x48] sm:$0xff]  ;;  %v206_v6 = vld [vmem:[#allocation10] sm:$0xff]  ;;  %vm749_vm1 = vcmask 261120   ;;  %s1482_s5 = smov [#allocation13]  }
  0x6f   :  { %v212_v7 = vld [vmem:[#allocation10 + $0x30] sm:$0xff]  ;;  %v1103_v8 = vpack.c.bf16 %v215_v5, %v209_v3  ;;  %v214_v11 = vld [vmem:[#allocation10 + $0x40] sm:$0xff]  ;;  %v219_v12 = vld [vmem:[#allocation10 + $0x68] sm:$0xff]  ;;  %s1060_s1 = sshll.u32 %s1482_s5, 4  ;;  %s1061_s1 = int_to_ptr.vmem [resolvable:$true] %s1060_s1 }
  0x70   :  { %v1089_v9 = vpack.c.bf16 %v212_v7, %v206_v6  ;;  %v208_v10 = vld [vmem:[#allocation10 + $0x10] sm:$0xff]  ;;  %1088 = vmatprep.subr.bf16.mxu0 %v1087_v4  ;;  %v225_v14 = vld [vmem:[#allocation10 + $0x98] sm:$0xff]  ;;  %v227_v16 = vld [vmem:[#allocation10 + $0xa8] sm:$0xff]  ;;  %s1439_s21 = scalar_lea.vmem %s1061_s1, 256  ;;  %p1444_p7 = scmp.lt.s32.totalorder %s1061_s1, %s1061_s1 }
  0x71   :  { %v1105_v13 = vpack.c.bf16 %v214_v11, %v208_v10  ;;  %v221_v15 = vld [vmem:[#allocation10 + $0x78] sm:$0xff]  ;;  %1104 = vmatprep.subr.bf16.mxu1 %v1103_v8  ;;  %v1091_v17 = vpack.c.bf16 %v225_v14, %v219_v12  ;;  %v218_v19 = vld [vmem:[#allocation10 + $0x60] sm:$0xff]  ;;  %v224_v20 = vld [vmem:[#allocation10 + $0x90] sm:$0xff]  ;;  %p1440_p6 = scmp.ne.s32.totalorder %s1061_s1, %s1439_s21  ;;  %p1445_p8 = scmp.lt.s32.totalorder %s1439_s21, %s1439_s21 }
  0x72   :  { %1090 = vmatpush1.bf16.msra.mxu0 %v1089_v9  ;;  %v1107_v18 = vpack.c.bf16 %v227_v16, %v221_v15  ;;  %v220_v21 = vld [vmem:[#allocation10 + $0x70] sm:$0xff]  ;;  %v1093_v22 = vpack.c.bf16 %v224_v20, %v218_v19  ;;  %v226_v23 = vld [vmem:[#allocation10 + $0xa0] sm:$0xff]  ;;  %v231_v24 = vld [vmem:[#allocation10 + $0xc8] sm:$0xff] }
  0x73   :  { %1106 = vmatpush1.bf16.msra.mxu1 %v1105_v13  ;;  %v237_v25 = vld [vmem:[#allocation10 + $0xf8] sm:$0xff]  ;;  %1092 = vmatprep.subr.bf16.mxu0 %v1091_v17  ;;  %v1109_v26 = vpack.c.bf16 %v226_v23, %v220_v21  ;;  %v239_v29 = vld [vmem:[#allocation10 + $0x108] sm:$0xff]  ;;  %v230_v30 = vld [vmem:[#allocation10 + $0xc0] sm:$0xff]  ;;  %p1446_p9 = por %p1445_p8, %p1444_p7 }
  0x74   :  { %1108 = vmatprep.subr.bf16.mxu1 %v1107_v18  ;;  %v1095_v27 = vpack.c.bf16 %v237_v25, %v231_v24  ;;  %v233_v28 = vld [vmem:[#allocation10 + $0xd8] sm:$0xff]  ;;  %v236_v32 = vld [vmem:[#allocation10 + $0xf0] sm:$0xff]  ;;  %v238_v34 = vld [vmem:[#allocation10 + $0x100] sm:$0xff] }
  0x75   :  { %v1111_v31 = vpack.c.bf16 %v239_v29, %v233_v28  ;;  %v232_v33 = vld [vmem:[#allocation10 + $0xd0] sm:$0xff]  ;;  %v1097_v35 = vpack.c.bf16 %v236_v32, %v230_v30  ;;  %v243_v36 = vld [vmem:[#allocation10 + $0x128] sm:$0xff]  ;;  %v249_v37 = vld [vmem:[#allocation10 + $0x158] sm:$0xff]  ;;  %p1447_p10 = pnand %p1446_p9, %p1440_p6 }
  0x76   :  { %1094 = vmatpush1.bf16.msra.mxu0 %v1093_v22  ;;  %v245_v38 = vld [vmem:[#allocation10 + $0x138] sm:$0xff]  ;;  %v1113_v39 = vpack.c.bf16 %v238_v34, %v232_v33  ;;  %v1099_v40 = vpack.c.bf16 %v249_v37, %v243_v36  ;;  %v251_v41 = vld [vmem:[#allocation10 + $0x168] sm:$0xff]  ;;  %v242_v42 = vld [vmem:[#allocation10 + $0x120] sm:$0xff] }
  0x77   :  { %1110 = vmatpush1.bf16.msra.mxu1 %v1109_v26  ;;  %1096 = vmatprep.subr.bf16.mxu0 %v1095_v27  ;;  %v248_v43 = vld [vmem:[#allocation10 + $0x150] sm:$0xff]  ;;  %v1115_v44 = vpack.c.bf16 %v251_v41, %v245_v38  ;;  %v250_v46 = vld [vmem:[#allocation10 + $0x160] sm:$0xff]  ;;  %v211_v47 = vld [vmem:[#allocation10 + $0x28] sm:$0xff] }
  0x78   :  { %1112 = vmatprep.subr.bf16.mxu1 %v1111_v31  ;;  %v244_v45 = vld [vmem:[#allocation10 + $0x130] sm:$0xff]  ;;  %v217_v48 = vld [vmem:[#allocation10 + $0x58] sm:$0xff]  ;;  %v109_v49 = vld [vmem:[#allocation8 + $0x8] sm:$0xff]  ;;  %v1101_v51 = vpack.c.bf16 %v248_v43, %v242_v42 }
  0x79   :  { %v115_v50 = vld [vmem:[#allocation8 + $0x38] sm:$0xff]  ;;  %v1117_v52 = vpack.c.bf16 %v250_v46, %v244_v45  ;;  %v1119_v53 = vpack.c.bf16 %v217_v48, %v211_v47  ;;  %v210_v54 = vld [vmem:[#allocation10 + $0x20] sm:$0xff]  ;;  %v216_v55 = vld [vmem:[#allocation10 + $0x50] sm:$0xff] }
  0x7a   :  { %1098 = vmatpush1.bf16.msra.mxu0 %v1097_v35  ;;  %v108_v56 = vld [vmem:[#allocation8] sm:$0xff]  ;;  %v1135_v57 = vpack.c.bf16 %v115_v50, %v109_v49  ;;  %v114_v58 = vld [vmem:[#allocation8 + $0x30] sm:$0xff]  ;;  %v223_v59 = vld [vmem:[#allocation10 + $0x88] sm:$0xff]  ;;  %v1121_v1 = vpack.c.bf16 %v216_v55, %v210_v54 }
  0x7b   :  { %1114 = vmatpush1.bf16.msra.mxu1 %v1113_v39  ;;  %1100 = vmatprep.subr.bf16.mxu0 %v1099_v40  ;;  %v229_v60 = vld [vmem:[#allocation10 + $0xb8] sm:$0xff]  ;;  %v121_v61 = vld [vmem:[#allocation8 + $0x68] sm:$0xff]  ;;  %v1631_v63 = vld [vmem:[#allocation5] sm:$0xff]  ;;  %v1137_v2 = vpack.c.bf16 %v114_v58, %v108_v56 }
  0x7c   :  { %1116 = vmatprep.subr.bf16.mxu1 %v1115_v44  ;;  %v127_v62 = vld [vmem:[#allocation8 + $0x98] sm:$0xff]  ;;  %v1123_v3 = vpack.c.bf16 %v229_v60, %v223_v59  ;;  %v222_v4 = vld [vmem:[#allocation10 + $0x80] sm:$0xff]  ;;  %v228_v5 = vld [vmem:[#allocation10 + $0xb0] sm:$0xff] }
  0x7d   :  { %v120_v6 = vld [vmem:[#allocation8 + $0x60] sm:$0xff]  ;;  %v1139_v7 = vpack.c.bf16 %v127_v62, %v121_v61  ;;  %v126_v8 = vld [vmem:[#allocation8 + $0x90] sm:$0xff]  ;;  %v235_v9 = vld [vmem:[#allocation10 + $0xe8] sm:$0xff]  ;;  %v1125_v13 = vpack.c.bf16 %v228_v5, %v222_v4 }
  0x7e   :  { %1102 = vmatpush1.bf16.msra.mxu0 %v1101_v51  ;;  %v241_v10 = vld [vmem:[#allocation10 + $0x118] sm:$0xff]  ;;  %v133_v11 = vld [vmem:[#allocation8 + $0xc8] sm:$0xff]  ;;  %v1141_v15 = vpack.c.bf16 %v126_v8, %v120_v6  ;;  %v234_v17 = vld [vmem:[#allocation10 + $0xe0] sm:$0xff] }
  0x7f   :  { %1118 = vmatpush1.bf16.msra.mxu1 %v1117_v52  ;;  %1120 = vmatprep.subr.bf16.mxu0 %v1119_v53  ;;  %v139_v12 = vld [vmem:[#allocation8 + $0xf8] sm:$0xff]  ;;  %v1637_v14 = vld [vmem:[#allocation5 + $0x8] sm:$0xff]  ;;  %v1127_v16 = vpack.c.bf16 %v241_v10, %v235_v9  ;;  %v240_v18 = vld [vmem:[#allocation10 + $0x110] sm:$0xff] }
  0x80   :  { %1136 = vmatprep.subr.bf16.mxu1 %v1135_v57  ;;  %v132_v19 = vld [vmem:[#allocation8 + $0xc0] sm:$0xff]  ;;  %v1143_v20 = vpack.c.bf16 %v139_v12, %v133_v11  ;;  %v138_v21 = vld [vmem:[#allocation8 + $0xf0] sm:$0xff]  ;;  %v247_v22 = vld [vmem:[#allocation10 + $0x148] sm:$0xff]  ;;  %v1129_v26 = vpack.c.bf16 %v240_v18, %v234_v17 }
  0x81   :  { %1075 = vmatmul.mubr.msk.f32.vlgmr.msra.gmra.mrb[0].mxu0 %vm254_vm0, %v1631_v63  ;;  %v253_v23 = vld [vmem:[#allocation10 + $0x178] sm:$0xff]  ;;  %v145_v24 = vld [vmem:[#allocation8 + $0x128] sm:$0xff]  ;;  %v1145_v27 = vpack.c.bf16 %v138_v21, %v132_v19  ;;  %v246_v29 = vld [vmem:[#allocation10 + $0x140] sm:$0xff] }
  0x82   :  { %1077 = vmatmul.mubr.msk.f32.vlgmr.msra.gmra.mrb[0].mxu1 %vm254_vm0, %v1631_v63  ;;  %1122 = vmatpush1.bf16.msra.mxu0 %v1121_v1  ;;  %v151_v25 = vld [vmem:[#allocation8 + $0x158] sm:$0xff]  ;;  %v1131_v28 = vpack.c.bf16 %v253_v23, %v247_v22  ;;  %v252_v30 = vld [vmem:[#allocation10 + $0x170] sm:$0xff]  ;;  %v144_v31 = vld [vmem:[#allocation8 + $0x120] sm:$0xff] }
  0x83   :  { %1138 = vmatpush1.bf16.msra.mxu1 %v1137_v2  ;;  %1124 = vmatprep.subr.bf16.mxu0 %v1123_v3  ;;  %v1147_v32 = vpack.c.bf16 %v151_v25, %v145_v24  ;;  %v150_v33 = vld [vmem:[#allocation8 + $0x150] sm:$0xff]  ;;  %v113_v34 = vld [vmem:[#allocation8 + $0x28] sm:$0xff]  ;;  %v119_v35 = vld [vmem:[#allocation8 + $0x58] sm:$0xff]  ;;  %v1133_v38 = vpack.c.bf16 %v252_v30, %v246_v29 }
  0x84   :  { %1140 = vmatprep.subr.bf16.mxu1 %v1139_v7  ;;  %331 = vmatprep.mubr.f32.mxu0 %v1481_v0  ;;  %v157_v36 = vld [vmem:[#allocation8 + $0x188] sm:$0xff]  ;;  %v163_v37 = vld [vmem:[#allocation8 + $0x1b8] sm:$0xff]  ;;  %v1149_v39 = vpack.c.bf16 %v150_v33, %v144_v31  ;;  %v1199_v40 = vpack.c.bf16 %v119_v35, %v113_v34  ;;  %v156_v41 = vld [vmem:[#allocation8 + $0x180] sm:$0xff] }
  0x85   :  { %1076 = vmatmul.mubr.msk.f32.gmra.mrb[2].mxu0 %vm254_vm0, %v1637_v14  ;;  %408 = vmatprep.mubr.f32.mxu1 %v1481_v0  ;;  %v112_v42 = vld [vmem:[#allocation8 + $0x20] sm:$0xff]  ;;  %v118_v43 = vld [vmem:[#allocation8 + $0x50] sm:$0xff]  ;;  %v1151_v44 = vpack.c.bf16 %v163_v37, %v157_v36  ;;  %v125_v46 = vld [vmem:[#allocation8 + $0x88] sm:$0xff] }
  0x86   :  { %1126 = vmatpush1.bf16.msra.mxu0 %v1125_v13  ;;  %479 = vmatprep.mubr.f32.mxu0 %v1481_v0  ;;  %v162_v45 = vld [vmem:[#allocation8 + $0x1b0] sm:$0xff]  ;;  %v131_v47 = vld [vmem:[#allocation8 + $0xb8] sm:$0xff]  ;;  %v169_v48 = vld [vmem:[#allocation8 + $0x1e8] sm:$0xff]  ;;  %v1201_v50 = vpack.c.bf16 %v118_v43, %v112_v42 }
  0x87   :  { %1142 = vmatpush1.bf16.msra.mxu1 %v1141_v15  ;;  %1128 = vmatprep.subr.bf16.mxu0 %v1127_v16  ;;  %v175_v49 = vld [vmem:[#allocation8 + $0x218] sm:$0xff]  ;;  %v1153_v51 = vpack.c.bf16 %v162_v45, %v156_v41  ;;  %v1203_v52 = vpack.c.bf16 %v131_v47, %v125_v46  ;;  %v168_v53 = vld [vmem:[#allocation8 + $0x1e0] sm:$0xff]  ;;  %v130_v55 = vld [vmem:[#allocation8 + $0xb0] sm:$0xff] }
  0x88   :  { %1144 = vmatprep.subr.bf16.mxu1 %v1143_v20  ;;  %1078 = vmatmul.mubr.msk.f32.gmra.mrb[2].mxu1 %vm254_vm0, %v1637_v14  ;;  %v124_v54 = vld [vmem:[#allocation8 + $0x80] sm:$0xff]  ;;  %v1155_v56 = vpack.c.bf16 %v175_v49, %v169_v48  ;;  %v174_v57 = vld [vmem:[#allocation8 + $0x210] sm:$0xff]  ;;  %v137_v58 = vld [vmem:[#allocation8 + $0xe8] sm:$0xff] }
  0x89   :  { %556 = vmatprep.mubr.f32.mxu1 %v1481_v0  ;;  %v143_v59 = vld [vmem:[#allocation8 + $0x118] sm:$0xff]  ;;  %v181_v60 = vld [vmem:[#allocation8 + $0x248] sm:$0xff]  ;;  %v1205_v62 = vpack.c.bf16 %v130_v55, %v124_v54  ;;  %v1157_v1 = vpack.c.bf16 %v174_v57, %v168_v53  ;;  %v180_v3 = vld [vmem:[#allocation8 + $0x240] sm:$0xff] }
  0x8a   :  { %1130 = vmatpush1.bf16.msra.mxu0 %v1129_v26  ;;  %v187_v61 = vld [vmem:[#allocation8 + $0x278] sm:$0xff]  ;;  %v1207_v2 = vpack.c.bf16 %v143_v59, %v137_v58  ;;  %v136_v4 = vld [vmem:[#allocation8 + $0xe0] sm:$0xff]  ;;  %v142_v5 = vld [vmem:[#allocation8 + $0x110] sm:$0xff] }
  0x8b   :  { %1146 = vmatpush1.bf16.msra.mxu1 %v1145_v27  ;;  %1132 = vmatprep.subr.bf16.mxu0 %v1131_v28  ;;  %v1159_v6 = vpack.c.bf16 %v187_v61, %v181_v60  ;;  %v186_v7 = vld [vmem:[#allocation8 + $0x270] sm:$0xff]  ;;  %v149_v8 = vld [vmem:[#allocation8 + $0x148] sm:$0xff]  ;;  %v155_v9 = vld [vmem:[#allocation8 + $0x178] sm:$0xff]  ;;  %v1209_v11 = vpack.c.bf16 %v142_v5, %v136_v4 }
  0x8c   :  { %1148 = vmatprep.subr.bf16.mxu1 %v1147_v32  ;;  %v193_v10 = vld [vmem:[#allocation8 + $0x2a8] sm:$0xff]  ;;  %v1161_v12 = vpack.c.bf16 %v186_v7, %v180_v3  ;;  %v1211_v13 = vpack.c.bf16 %v155_v9, %v149_v8  ;;  %v192_v15 = vld [vmem:[#allocation8 + $0x2a0] sm:$0xff]  ;;  %v154_v17 = vld [vmem:[#allocation8 + $0x170] sm:$0xff] }
  0x8d   :  { %v148_v16 = vld [vmem:[#allocation8 + $0x140] sm:$0xff]  ;;  %v198_v19 = vld [vmem:[#allocation8 + $0x2d0] sm:$0xff]  ;;  %v161_v20 = vld [vmem:[#allocation8 + $0x1a8] sm:$0xff] }
  0x8e   :  { %1134 = vmatpush1.bf16.msra.mxu0 %v1133_v38  ;;  %v167_v21 = vld [vmem:[#allocation8 + $0x1d8] sm:$0xff]  ;;  %v117_v23 = vld [vmem:[#allocation8 + $0x48] sm:$0xff]  ;;  %v1165_v24 = vpack.c.bf16 %v198_v19, %v192_v15  ;;  %v160_v26 = vld [vmem:[#allocation8 + $0x1a0] sm:$0xff] }
  0x8f   :  { %1150 = vmatpush1.bf16.msra.mxu1 %v1149_v39  ;;  %1200 = vmatprep.subr.bf16.mxu0 %v1199_v40  ;;  %v111_v22 = vld [vmem:[#allocation8 + $0x18] sm:$0xff]  ;;  %v1215_v25 = vpack.c.bf16 %v167_v21, %v161_v20  ;;  %v166_v27 = vld [vmem:[#allocation8 + $0x1d0] sm:$0xff]  ;;  %v116_v30 = vld [vmem:[#allocation8 + $0x40] sm:$0xff] }
  0x90   :  { %1152 = vmatprep.subr.bf16.mxu1 %v1151_v44  ;;  %v1167_v28 = vpack.c.bf16 %v117_v23, %v111_v22  ;;  %v110_v29 = vld [vmem:[#allocation8 + $0x10] sm:$0xff]  ;;  %v123_v31 = vld [vmem:[#allocation8 + $0x78] sm:$0xff]  ;;  %v129_v32 = vld [vmem:[#allocation8 + $0xa8] sm:$0xff]  ;;  %v1217_v36 = vpack.c.bf16 %v166_v27, %v160_v26 }
  0x91   :  { %1079 = vmatmul.mubr.msk.f32.vlgmr.msra.gmra.mrb[4].mxu0 %vm254_vm0, %v1631_v63  ;;  %v199_v63 = vld [vmem:[#allocation8 + $0x2d8] sm:$0xff]  ;;  %v173_v33 = vld [vmem:[#allocation8 + $0x208] sm:$0xff]  ;;  %v1653_v35 = vld [vmem:[#allocation2] sm:$0xff]  ;;  %v1169_v37 = vpack.c.bf16 %v116_v30, %v110_v29  ;;  %v1171_v41 = vpack.c.bf16 %v129_v32, %v123_v31 }
  0x92   :  { %1202 = vmatpush1.bf16.msra.mxu0 %v1201_v50  ;;  %485 = vmatprep.mubr.f32.mxu0 %v1481_v0  ;;  %v1163_v18 = vpack.c.bf16 %v199_v63, %v193_v10  ;;  %v179_v34 = vld [vmem:[#allocation8 + $0x238] sm:$0xff]  ;;  %v122_v38 = vld [vmem:[#allocation8 + $0x70] sm:$0xff]  ;;  %v172_v39 = vld [vmem:[#allocation8 + $0x200] sm:$0xff] }
  0x93   :  { %1154 = vmatpush1.bf16.msra.mxu1 %v1153_v51  ;;  %1204 = vmatprep.subr.bf16.mxu0 %v1203_v52  ;;  %v178_v40 = vld [vmem:[#allocation8 + $0x230] sm:$0xff]  ;;  %v1219_v42 = vpack.c.bf16 %v179_v34, %v173_v33  ;;  %v128_v43 = vld [vmem:[#allocation8 + $0xa0] sm:$0xff]  ;;  %v185_v44 = vld [vmem:[#allocation8 + $0x268] sm:$0xff] }
  0x94   :  { %1156 = vmatprep.subr.bf16.mxu1 %v1155_v56  ;;  %v191_v45 = vld [vmem:[#allocation8 + $0x298] sm:$0xff]  ;;  %v141_v47 = vld [vmem:[#allocation8 + $0x108] sm:$0xff]  ;;  %v1221_v49 = vpack.c.bf16 %v178_v40, %v172_v39  ;;  %v1173_v50 = vpack.c.bf16 %v128_v43, %v122_v38  ;;  %v134_v52 = vld [vmem:[#allocation8 + $0xd0] sm:$0xff] }
  0x95   :  { %1080 = vmatmul.mubr.msk.f32.gmra.mrb[6].mxu0 %vm254_vm0, %v1637_v14  ;;  %v1213_v14 = vpack.c.bf16 %v154_v17, %v148_v16  ;;  %v135_v46 = vld [vmem:[#allocation8 + $0xd8] sm:$0xff]  ;;  %v1223_v51 = vpack.c.bf16 %v191_v45, %v185_v44  ;;  %v184_v53 = vld [vmem:[#allocation8 + $0x260] sm:$0xff]  ;;  %v190_v54 = vld [vmem:[#allocation8 + $0x290] sm:$0xff] }
  0x96   :  { %1206 = vmatpush1.bf16.msra.mxu0 %v1205_v62  ;;  %710 = vmatprep.mubr.f32.mxu0 %v1481_v0  ;;  %v1656_v48 = vld [vmem:[#allocation2 + $0x8] sm:$0xff]  ;;  %v1175_v55 = vpack.c.bf16 %v141_v47, %v135_v46  ;;  %v140_v56 = vld [vmem:[#allocation8 + $0x100] sm:$0xff]  ;;  %v197_v57 = vld [vmem:[#allocation8 + $0x2c8] sm:$0xff]  ;;  %v1225_v61 = vpack.c.bf16 %v190_v54, %v184_v53 }
  0x97   :  { %1158 = vmatpush1.bf16.msra.mxu1 %v1157_v1  ;;  %1208 = vmatprep.subr.bf16.mxu0 %v1207_v2  ;;  %v203_v58 = vld [vmem:[#allocation8 + $0x2f8] sm:$0xff]  ;;  %v153_v60 = vld [vmem:[#allocation8 + $0x168] sm:$0xff]  ;;  %v1177_v62 = vpack.c.bf16 %v140_v56, %v134_v52  ;;  %v146_v2 = vld [vmem:[#allocation8 + $0x130] sm:$0xff] }
  0x98   :  { %1160 = vmatprep.subr.bf16.mxu1 %v1159_v6  ;;  %v147_v59 = vld [vmem:[#allocation8 + $0x138] sm:$0xff]  ;;  %v1227_v1 = vpack.c.bf16 %v203_v58, %v197_v57  ;;  %v196_v3 = vld [vmem:[#allocation8 + $0x2c0] sm:$0xff]  ;;  %v202_v4 = vld [vmem:[#allocation8 + $0x2f0] sm:$0xff] }
  0x99   :  { %v1179_v5 = vpack.c.bf16 %v153_v60, %v147_v59  ;;  %v152_v6 = vld [vmem:[#allocation8 + $0x160] sm:$0xff]  ;;  %v726_v7 = vld [vmem:[#allocation11 + $0x8] sm:$0xff]  ;;  %v732_v8 = vld [vmem:[#allocation11 + $0x38] sm:$0xff]  ;;  %v1229_v63 = vpack.c.bf16 %v202_v4, %v196_v3 }
  0x9a   :  { %1210 = vmatpush1.bf16.msra.mxu0 %v1209_v11  ;;  %v159_v9 = vld [vmem:[#allocation8 + $0x198] sm:$0xff]  ;;  %v165_v10 = vld [vmem:[#allocation8 + $0x1c8] sm:$0xff]  ;;  %v1181_v11 = vpack.c.bf16 %v152_v6, %v146_v2  ;;  %v725_v15 = vld [vmem:[#allocation11] sm:$0xff] }
  0x9b   :  { %1162 = vmatpush1.bf16.msra.mxu1 %v1161_v12  ;;  %1212 = vmatprep.subr.bf16.mxu0 %v1211_v13  ;;  %v1231_v12 = vpack.c.bf16 %v732_v8, %v726_v7  ;;  %v158_v13 = vld [vmem:[#allocation8 + $0x190] sm:$0xff]  ;;  %v1183_v17 = vpack.c.bf16 %v165_v10, %v159_v9  ;;  %v738_v19 = vld [vmem:[#allocation11 + $0x68] sm:$0xff]  ;;  %v744_v20 = vld [vmem:[#allocation11 + $0x98] sm:$0xff] }
  0x9c   :  { %1164 = vmatprep.subr.bf16.mxu1 %v1163_v18  ;;  %v731_v16 = vld [vmem:[#allocation11 + $0x30] sm:$0xff]  ;;  %v164_v18 = vld [vmem:[#allocation8 + $0x1c0] sm:$0xff]  ;;  %v171_v21 = vld [vmem:[#allocation8 + $0x1f8] sm:$0xff] }
  0x9d   :  { %v177_v22 = vld [vmem:[#allocation8 + $0x228] sm:$0xff]  ;;  %v1233_v23 = vpack.c.bf16 %v731_v16, %v725_v15  ;;  %v737_v26 = vld [vmem:[#allocation11 + $0x60] sm:$0xff]  ;;  %v743_v27 = vld [vmem:[#allocation11 + $0x90] sm:$0xff] }
  0x9e   :  { %1214 = vmatpush1.bf16.msra.mxu0 %v1213_v14  ;;  %v1185_v14 = vpack.c.bf16 %v164_v18, %v158_v13  ;;  %v176_v29 = vld [vmem:[#allocation8 + $0x220] sm:$0xff]  ;;  %v730_v30 = vld [vmem:[#allocation11 + $0x28] sm:$0xff]  ;;  %v736_v31 = vld [vmem:[#allocation11 + $0x58] sm:$0xff]  ;;  %v1237_v34 = vpack.c.bf16 %v743_v27, %v737_v26 }
  0x9f   :  { %1166 = vmatpush1.bf16.msra.mxu1 %v1165_v24  ;;  %1216 = vmatprep.subr.bf16.mxu0 %v1215_v25  ;;  %v1235_v24 = vpack.c.bf16 %v744_v20, %v738_v19  ;;  %v170_v25 = vld [vmem:[#allocation8 + $0x1f0] sm:$0xff]  ;;  %v183_v32 = vld [vmem:[#allocation8 + $0x258] sm:$0xff]  ;;  %v189_v33 = vld [vmem:[#allocation8 + $0x288] sm:$0xff] }
  0xa0   :  { %1168 = vmatprep.subr.bf16.mxu1 %v1167_v28  ;;  %v1187_v28 = vpack.c.bf16 %v177_v22, %v171_v21  ;;  %v182_v38 = vld [vmem:[#allocation8 + $0x250] sm:$0xff]  ;;  %v729_v39 = vld [vmem:[#allocation11 + $0x20] sm:$0xff]  ;;  %v742_v43 = vld [vmem:[#allocation11 + $0x88] sm:$0xff] }
  0xa1   :  { %v735_v40 = vld [vmem:[#allocation11 + $0x50] sm:$0xff]  ;;  %v748_v44 = vld [vmem:[#allocation11 + $0xb8] sm:$0xff]  ;;  %v201_v46 = vld [vmem:[#allocation8 + $0x2e8] sm:$0xff] }
  0xa2   :  { %557 = vmatmul.mubr.f32.vlgmr.msra.gmra.mrb[4].mxu1 %v1653_v35  ;;  %1218 = vmatpush1.bf16.msra.mxu0 %v1217_v36  ;;  %v1189_v36 = vpack.c.bf16 %v176_v29, %v170_v25  ;;  %v195_v45 = vld [vmem:[#allocation8 + $0x2b8] sm:$0xff]  ;;  %v723_v47 = vld [vmem:[#allocation7] sm:$0xff]  ;;  %v741_v52 = vld [vmem:[#allocation11 + $0x80] sm:$0xff] }
  0xa3   :  { %1170 = vmatpush1.bf16.msra.mxu1 %v1169_v37  ;;  %562 = vmatprep.mubr.f32.mxu1 %v1481_v0  ;;  %v1247_v37 = vpack.c.bf16 %v736_v31, %v730_v30  ;;  %v747_v53 = vld [vmem:[#allocation11 + $0xb0] sm:$0xff]  ;;  %v1195_v54 = vpack.c.bf16 %v201_v46, %v195_v45  ;;  %v200_v56 = vld [vmem:[#allocation8 + $0x2e0] sm:$0xff]  ;;  %v728_v57 = vld [vmem:[#allocation11 + $0x18] sm:$0xff] }
  0xa4   :  { %1172 = vmatprep.subr.bf16.mxu1 %v1171_v41  ;;  %1220 = vmatprep.subr.bf16.mxu0 %v1219_v42  ;;  %v1191_v41 = vpack.c.bf16 %v189_v33, %v183_v32  ;;  %v188_v42 = vld [vmem:[#allocation8 + $0x280] sm:$0xff]  ;;  %v734_v58 = vld [vmem:[#allocation11 + $0x48] sm:$0xff]  ;;  %v724_v59 = vld [vmem:[#allocation7 + $0x8] sm:$0xff]  ;;  %v1253_v60 = vpack.c.bf16 %v747_v53, %v741_v52 }
  0xa5   :  { %v733_v2 = vld [vmem:[#allocation11 + $0x40] sm:$0xff]  ;;  %v740_v3 = vld [vmem:[#allocation11 + $0x78] sm:$0xff]  ;;  %v746_v4 = vld [vmem:[#allocation11 + $0xa8] sm:$0xff] }
  0xa6   :  { %563 = vmatmul.mubr.f32.gmra.mrb[6].mxu1 %v1656_v48  ;;  %1222 = vmatpush1.bf16.msra.mxu0 %v1221_v49  ;;  %v1249_v49 = vpack.c.bf16 %v735_v40, %v729_v39  ;;  %v1243_v6 = vpack.c.bf16 %v746_v4, %v740_v3  ;;  %v739_v7 = vld [vmem:[#allocation11 + $0x70] sm:$0xff]  ;;  %v745_v8 = vld [vmem:[#allocation11 + $0xa0] sm:$0xff] }
  0xa7   :  { %1174 = vmatpush1.bf16.msra.mxu1 %v1173_v50  ;;  %1224 = vmatprep.subr.bf16.mxu0 %v1223_v51  ;;  %v1193_v50 = vpack.c.bf16 %v188_v42, %v182_v38  ;;  %v1251_v51 = vpack.c.bf16 %v748_v44, %v742_v43  ;;  %v1245_v9 = vpack.c.bf16 %v745_v8, %v739_v7 }
  0xa8   :  { %1176 = vmatprep.subr.bf16.mxu1 %v1175_v55  ;;  %633 = vmatprep.mubr.f32.mxu1 %v1481_v0  ;;  %v194_v55 = vld [vmem:[#allocation8 + $0x2b0] sm:$0xff] }
  0xaa   :  { %1226 = vmatpush1.bf16.msra.mxu0 %v1225_v61  ;;  %v1197_v61 = vpack.c.bf16 %v200_v56, %v194_v55 }
  0xab   :  { %1178 = vmatpush1.bf16.msra.mxu1 %v1177_v62  ;;  %1228 = vmatprep.subr.bf16.mxu0 %v1227_v1  ;;  %v1239_v62 = vpack.c.bf16 %v734_v58, %v728_v57  ;;  %v727_v1 = vld [vmem:[#allocation11 + $0x10] sm:$0xff] }
  0xac   :  { %1180 = vmatprep.subr.bf16.mxu1 %v1179_v5  ;;  %v1241_v5 = vpack.c.bf16 %v733_v2, %v727_v1 }
  0xae   :  { %1230 = vmatpush1.bf16.msra.mxu0 %v1229_v63 }
  0xaf   :  { %1182 = vmatpush1.bf16.msra.mxu1 %v1181_v11  ;;  %1232 = vmatprep.subr.bf16.mxu0 %v1231_v12 }
  0xb0   :  { %1184 = vmatprep.subr.bf16.mxu1 %v1183_v17 }
  0xb1   :  { %711 = vmatmul.mubr.f32.vlgmr.msra.gmra.mrb[4].mxu0 %v1653_v35 }
  0xb2   :  { %1234 = vmatpush1.bf16.msra.mxu0 %v1233_v23  ;;  %716 = vmatprep.mubr.f32.mxu0 %v1481_v0 }
  0xb3   :  { %1186 = vmatpush1.bf16.msra.mxu1 %v1185_v14  ;;  %1236 = vmatprep.subr.bf16.mxu0 %v1235_v24 }
  0xb4   :  { %1188 = vmatprep.subr.bf16.mxu1 %v1187_v28 }
  0xb5   :  { %717 = vmatmul.mubr.f32.gmra.mrb[6].mxu0 %v1656_v48 }
  0xb6   :  { %1238 = vmatpush1.bf16.msra.mxu0 %v1237_v34  ;;  %820 = vmatprep.mubr.f32.mxu0 %v1481_v0 }
  0xb7   :  { %1190 = vmatpush1.bf16.msra.mxu1 %v1189_v36  ;;  %1248 = vmatprep.subr.bf16.mxu0 %v1247_v37 }
  0xb8   :  { %1192 = vmatprep.subr.bf16.mxu1 %v1191_v41 }
  0xb9   :  { %1081 = vmatmul.mubr.msk.f32.vlgmr.msra.gmra.mrb[8].mxu0 %vm749_vm1, %v723_v47 }
  0xba   :  { %1250 = vmatpush1.bf16.msra.mxu0 %v1249_v49  ;;  %826 = vmatprep.mubr.f32.mxu0 %v1481_v0 }
  0xbb   :  { %1194 = vmatpush1.bf16.msra.mxu1 %v1193_v50  ;;  %1252 = vmatprep.subr.bf16.mxu0 %v1251_v51 }
  0xbc   :  { %1196 = vmatprep.subr.bf16.mxu1 %v1195_v54 }
  0xbd   :  { %1082 = vmatmul.mubr.msk.f32.gmra.mrb[10].mxu0 %vm749_vm1, %v724_v59 }
  0xbe   :  { %1254 = vmatpush1.bf16.msra.mxu0 %v1253_v60  ;;  %974 = vmatprep.mubr.f32.mxu0 %v1481_v0 }
  0xbf   :  { %1198 = vmatpush1.bf16.msra.mxu1 %v1197_v61 }
  0xc0   :  { %1240 = vmatprep.subr.bf16.mxu1 %v1239_v62 }
  0xc1   :  { %1085 = vmatmul.mubr.msk.f32.vlgmr.msra.gmra.mrb[4].mxu0 %vm749_vm1, %v723_v47 }
  0xc2   :  { %634 = vmatmul.mubr.f32.vlgmr.msra.gmra.mrb[0].mxu1 %v1653_v35  ;;  %980 = vmatprep.mubr.f32.mxu0 %v1481_v0 }
  0xc3   :  { %1242 = vmatpush1.bf16.msra.mxu1 %v1241_v5  ;;  %639 = vmatprep.mubr.f32.mxu1 %v1481_v0 }
  0xc4   :  { %1244 = vmatprep.subr.bf16.mxu1 %v1243_v6 }
  0xc5   :  { %1086 = vmatmul.mubr.msk.f32.gmra.mrb[6].mxu0 %vm749_vm1, %v724_v59 }
  0xc6   :  { %640 = vmatmul.mubr.f32.gmra.mrb[2].mxu1 %v1656_v48 }
  0xc7   :  { %1246 = vmatpush1.bf16.msra.mxu1 %v1245_v9  ;;  %897 = vmatprep.mubr.f32.mxu1 %v1481_v0 }
  0xca   :  { %1083 = vmatmul.mubr.msk.f32.vlgmr.msra.gmra.mrb[0].mxu1 %vm749_vm1, %v723_v47 }
  0xcb   :  { %903 = vmatprep.mubr.f32.mxu1 %v1481_v0 }
  0xce   :  { %1084 = vmatmul.mubr.msk.f32.gmra.mrb[2].mxu1 %vm749_vm1, %v724_v59 }
 0x154   :  { %v327_v35 = vpop.f32.mrb[0].mxu0 }
 0x155   :  { %v329_v10 = vpop.f32.mrb[1].mxu0 }
 0x158   :  { %v333_v63 = vpop.f32.mrb[2].mxu0 }
 0x159   :  { %v335_v11 = vpop.f32.mrb[3].mxu0 }
 0x175   :  { %v558_v12 = vpop.f32.mrb[4].mxu1 }
 0x176   :  { %v559_v13 = vadd.f32 %v558_v12, %v327_v35  ;;  %v560_v15 = vpop.f32.mrb[5].mxu1 }
 0x177   :  { %v561_v16 = vadd.f32 %v560_v15, %v329_v10 }
 0x179   :  { %v564_v17 = vpop.f32.mrb[6].mxu1 }
 0x17a   :  { %v565_v18 = vadd.f32 %v564_v17, %v333_v63  ;;  %v566_v48 = vpop.f32.mrb[7].mxu1 }
 0x17b   :  { %v567_v19 = vadd.f32 %v566_v48, %v335_v11 }
 0x18c   :  { %v822_v20 = vpop.f32.mrb[8].mxu0 }
 0x18d   :  { %v987_v21 = vadd.f32 %v822_v20, %v559_v13  ;;  %v824_v22 = vpop.f32.mrb[9].mxu0 }
 0x18e   :  { %v988_v23 = vadd.f32 %v824_v22, %v561_v16 }
 0x190   :  { %v828_v14 = vpop.f32.mrb[10].mxu0 }
 0x191   :  { %v993_v0 = vadd.f32 %v828_v14, %v565_v18  ;;  %v830_v24 = vpop.f32.mrb[11].mxu0 }
 0x192   :  { %v994_v25 = vadd.f32 %v830_v24, %v567_v19 }
 0x194   :  { %v976_v26 = vpop.f32.mrb[4].mxu0 }
 0x195   :  { %v978_v27 = vpop.f32.mrb[5].mxu0  ;;  %v1003_v30 = vmul.f32 0.02, %v976_v26 }
 0x196   :  { %v1007_v33 = vmul.f32 0.02, %v978_v27 }
 0x197   :  { %v1005_v36 = vmax.f32 %v976_v26, %v1003_v30 }
 0x198   :  { %v982_v28 = vpop.f32.mrb[6].mxu0  ;;  %v1009_v42 = vmax.f32 %v978_v27, %v1007_v33 }
 0x199   :  { %v984_v29 = vpop.f32.mrb[7].mxu0  ;;  %v1004_v37 = vmul.f32 0.02, %v982_v28 }
 0x19a   :  { %v1008_v40 = vmul.f32 0.02, %v984_v29 }
 0x19b   :  { %v1006_v45 = vmax.f32 %v982_v28, %v1004_v37 }
 0x19c   :  { %v1010_v49 = vmax.f32 %v984_v29, %v1008_v40 }
 0x19d   :  { %v899_v31 = vpop.f32.mrb[0].mxu1 }
 0x19e   :  { %v901_v32 = vpop.f32.mrb[1].mxu1 }
 0x19f   :  { %v999_v34 = vmul.f32 0.02, %v901_v32 }
 0x1a1   :  { %v1001_v38 = vmax.f32 %v901_v32, %v999_v34  ;;  %v905_v39 = vpop.f32.mrb[2].mxu1 }
 0x1a2   :  { %v907_v41 = vpop.f32.mrb[3].mxu1 }
 0x1a3   :  { %v1011_v43 = vmax.f32 %v1001_v38, %v1005_v36  ;;  %v1000_v44 = vmul.f32 0.02, %v907_v41 }
 0x1a5   :  { %v1013_v46 = vmax.f32 %v1011_v43, %v1009_v42  ;;  %v1002_v47 = vmax.f32 %v907_v41, %v1000_v44 }
 0x1a7   :  { %v1015_v50 = vsub.f32 %v1001_v38, %v1013_v46  ;;  %v1021_v51 = vsub.f32 %v1005_v36, %v1013_v46  ;;  %v1027_v52 = vsub.f32 %v1009_v42, %v1013_v46  ;;  %v1012_v53 = vmax.f32 %v1002_v47, %v1006_v45 }
 0x1a9   :  { %v1017_v54 = vmul.f32 1.442695, %v1015_v50  ;;  %v1023_v55 = vmul.f32 1.442695, %v1021_v51  ;;  %v1029_v56 = vmul.f32 1.442695, %v1027_v52  ;;  %v1014_v57 = vmax.f32 %v1012_v53, %v1010_v49 }
 0x1ab   :  { %1291 = vpow2.f32 %v1017_v54  ;;  %v1016_v58 = vsub.f32 %v1002_v47, %v1014_v57  ;;  %v1022_v59 = vsub.f32 %v1006_v45, %v1014_v57  ;;  %v1028_v60 = vsub.f32 %v1010_v49, %v1014_v57 }
 0x1ac   :  { %1293 = vpow2.f32 %v1023_v55 }
 0x1ad   :  { %1295 = vpow2.f32 %v1029_v56  ;;  %v1019_v61 = vmul.f32 1.442695, %v1016_v58  ;;  %v1025_v62 = vmul.f32 1.442695, %v1022_v59  ;;  %v1031_v1 = vmul.f32 1.442695, %v1028_v60 }
 0x1af   :  { %1297 = vpow2.f32 %v1019_v61 }
 0x1b0   :  { %1299 = vpow2.f32 %v1025_v62 }
 0x1b1   :  { %1301 = vpow2.f32 %v1031_v1 }
 0x1b5   :  { %v1292_v2 = vpop.eup %1291 }
 0x1b6   :  { %v1294_v3 = vpop.eup %1293  ;;  %v1041_v4 = vmul.f32 %v1292_v2, %v987_v21 }
 0x1b7   :  { %v1296_v5 = vpop.eup %1295  ;;  %v1033_v6 = vadd.f32 %v1294_v3, %v1292_v2  ;;  %v1043_v7 = vmul.f32 %v1294_v3, %v988_v23 }
 0x1b8   :  { %v1047_v8 = vmul.f32 %v1296_v5, %v899_v31 }
 0x1b9   :  { %v1298_v9 = vpop.eup %1297  ;;  %v1035_v35 = vadd.f32 %v1296_v5, %v1033_v6  ;;  %v1045_v10 = vadd.f32 %v1043_v7, %v1041_v4 }
 0x1ba   :  { %v1300_v63 = vpop.eup %1299  ;;  %v1042_v11 = vmul.f32 %v1298_v9, %v993_v0 }
 0x1bb   :  { %v1302_v12 = vpop.eup %1301  ;;  %v1034_v13 = vadd.f32 %v1300_v63, %v1298_v9  ;;  %1303 = vrcp.f32 %v1035_v35  ;;  %v1044_v15 = vmul.f32 %v1300_v63, %v994_v25  ;;  %v1049_v16 = vadd.f32 %v1047_v8, %v1045_v10 }
 0x1bc   :  { %v1048_v17 = vmul.f32 %v1302_v12, %v905_v39 }
 0x1bd   :  { %v1036_v18 = vadd.f32 %v1302_v12, %v1034_v13  ;;  %v1046_v48 = vadd.f32 %v1044_v15, %v1042_v11 }
 0x1bf   :  { %1305 = vrcp.f32 %v1036_v18  ;;  %v1050_v19 = vadd.f32 %v1048_v17, %v1046_v48 }
 0x1c5   :  { %v1304_v20 = vpop.eup %1303 }
 0x1c6   :  { %v1051_v21 = vmul.f32 %v1304_v20, %v1049_v16 }
 0x1c8   :  { %1053 = vst [vmem:[#allocation13] sm:$0xff] %v1051_v21 }
 0x1c9   :  { %v1306_v22 = vpop.eup %1305 }
 0x1ca   :  { %v1052_v23 = vmul.f32 %v1306_v22, %v1050_v19 }
 0x1cc   :  { %1054 = vst [vmem:[#allocation13 + $0x8] sm:$0xff] %v1052_v23 }
 0x1cd   :  { %1450 = shalt.err (!%p1447_p10)
}
 0x1ce   :  { %s1451_s27 = scalar_lea.hbm %s1700_s6, 256 }
 0x1cf   :  { %p1452_p11 = scmp.ne.s32.totalorder %s1700_s6, %s1451_s27  ;;  %p1455_p12 = scmp.lt.u32.totalorder %s1451_s27, %s1700_s6 }
 0x1d1   :  { %p1457_p13 = pnand %p1455_p12, %p1452_p11 }
 0x1d3   :  { %1460 = shalt.err (!%p1457_p13)
}
 0x1d4   :  { %1066 = dma.vmem_to_hbm [thread:$0]  %s1061_s1, 256, %s1700_s6, [#allocation4], %s1473_s9, %s1473_s9, %s1474_s10  }
 0x1d5   :  { %1469 = dma.done.wait [#allocation4], 256  }
 0x1d6   :  { %1470 = vsyncadd [#allocation4], 4294967040 }
 0x1d7   :  { %1070 = vsyncpa [#allocation3], 1 }
 0x1d8   :  { %1071 = vsyncpa [#allocation6], 1 }
 0x1d9   :  { %1072 = vsyncpa [#allocation9], 1 }
 0x1da   :  { %1073 = vsyncpa [#allocation12], 1 }
 0x1db   :  { %1074 = vsyncpa [#allocation4], 1 }

</bundles_post_ra>
